<compile_context>
chip_gen: v5e
topology: v5e:2x2
jax: 0.10.0
libtpu: 0.0.40
codegen_flags: <defaults>
</compile_context>

<pallas_src>
import functools

import jax
import jax.numpy as jnp
from jax import lax
from jax.experimental import pallas as pl
from jax.experimental.pallas import tpu as pltpu


# ----------------------------- fused kernel ---------------------------------
def bottleneck_kernel(x_ref, w1_ref, s1_ref, b1_ref,
                      w2_ref, s2_ref, b2_ref,
                      w3_ref, s3_ref, b3_ref,
                      o_ref, *, img_rows):
    """B_TILE images per grid step, packed as 2-D row slabs (lane = W*channels).

    x_ref  : (B*H, W*Cin)      input rows (also the residual; Cin == C3 here)
    w1_ref : (W*Cin, W*C1)     bf16 block-diag folded select+gate+conv1 (1x1)
    w2_ref : (W*C1, 3*W*C2)    bf16 concatenated 3x3 row-tap bands (ky=0,1,2)
    w3_ref : (W*C2, W*C3)      bf16 block-diag conv3 (1x1)
    s*/b*  : (1, W*Ck)         f32 folded BN+gate scale / bias, lane-tiled
    o_ref  : (B*H, W*C3)       output rows (lane-dense store)
    img_rows : H (static) — rows per image, for per-image edge masking.
    """
    x = x_ref[...]                                            # f32, residual

    # conv1 (1x1) + bn1 + gate1 + relu (select / input-gate folded into w1).
    h1 = jnp.dot(x.astype(jnp.bfloat16), w1_ref[...],
                 preferred_element_type=jnp.float32)
    h1 = jnp.maximum(h1 * s1_ref[...] + b1_ref[...], 0.0)     # (B*H, W*C1) f32

    # conv2 (3x3, pad=1): one MXU push over the 3 concatenated row-tap bands,
    # then sublane rolls (XLU) + per-image edge masks replace the padded
    # scratch buffer.  Column shift / zero pad is folded into the bands.
    wc2 = s2_ref.shape[1]
    y = jnp.dot(h1.astype(jnp.bfloat16), w2_ref[...],
                preferred_element_type=jnp.float32)           # (B*H, 3*W*C2)
    y_km1 = y[:, 0 * wc2:1 * wc2]     # tap ky=0: needs input row h-1
    y_k0 = y[:, 1 * wc2:2 * wc2]      # tap ky=1: input row h
    y_kp1 = y[:, 2 * wc2:3 * wc2]     # tap ky=2: needs input row h+1

    n_rows = y_k0.shape[0]
    r = lax.broadcasted_iota(jnp.int32, y_k0.shape, 0) % img_rows
    acc = y_k0
    acc = acc + jnp.where(r == 0, 0.0,
                          pltpu.roll(y_km1, shift=1, axis=0))
    acc = acc + jnp.where(r == img_rows - 1, 0.0,
                          pltpu.roll(y_kp1, shift=n_rows - 1, axis=0))
    h2 = jnp.maximum(acc * s2_ref[...] + b2_ref[...], 0.0)    # (B*H, W*C2) f32

    # conv3 (1x1) + bn3 + gate3 + residual add + relu (f32 epilogue,
    # lane-dense unmasked store).
    h3 = jnp.dot(h2.astype(jnp.bfloat16), w3_ref[...],
                 preferred_element_type=jnp.float32)
    o_ref[...] = jnp.maximum(h3 * s3_ref[...] + b3_ref[...] + x,
                             0.0).astype(o_ref.dtype)


# --------------------------- host-side folding -------------------------------
def fold_params(p, inplanes, W, mxu_dtype=jnp.bfloat16):
    """Fold select/input-gate/BN/gates into lane-packed matmul weights.

    Call ONCE (outside the jitted forward) — the folding is call-invariant.
    Matmul weights are cast to bf16 for single-pass MXU; scales/biases stay f32.
    """
    f32 = jnp.float32
    c1 = p["w1"].shape[1]

    # ChannelSelect + input SparseGate folded into the 1x1 conv weight:
    #   x_sel * ig @ w1  ==  x @ w1_full,  w1_full[select_idx[j]] += ig[j]*w1[j]
    w1_full = jnp.zeros((inplanes, c1), f32).at[p["select_idx"]].add(
        p["ig"][:, None] * p["w1"])

    eye_w = jnp.eye(W, dtype=f32)
    w1b = jnp.kron(eye_w, w1_full)                     # (W*Cin, W*C1)
    w3b = jnp.kron(eye_w, p["w3"])                     # (W*C2, W*C3)
    # Banded 3x3 weights: for row tap ky, band B_ky[(w+kx-1)*C1+c1, w*C2+c2]
    # = w2[ky,kx,c1,c2]; out-of-range column taps vanish (implicit zero pad).
    bands = [sum(jnp.kron(jnp.eye(W, W, k=1 - kx, dtype=f32), p["w2"][ky, kx])
                 for kx in range(3))
             for ky in range(3)]
    w2cat = jnp.concatenate(bands, axis=1)             # (W*C1, 3*W*C2)

    def lane_tile(v):
        return jnp.tile(v, W)[None, :].astype(f32)     # (1, W*C)

    return dict(
        w1b=w1b.astype(mxu_dtype),
        w2cat=w2cat.astype(mxu_dtype),
        w3b=w3b.astype(mxu_dtype),
        s1b=lane_tile(p["s1"]), b1b=lane_tile(p["b1"]),
        s2b=lane_tile(p["s2"]), b2b=lane_tile(p["b2"]),
        s3b=lane_tile(p["s3"]), b3b=lane_tile(p["b3"]))


# ------------------------------- wrappers -------------------------------------
def bottleneck_forward_rows(x_rows, folded, *, img_rows, block_batch=4):
    """Layout-native forward: x_rows is (N*H, W*Cin) lane-dense row slabs."""
    total_rows, wcin = x_rows.shape
    H = img_rows
    N = total_rows // H
    wc1 = folded["w1b"].shape[1]
    wc2 = folded["s2b"].shape[1]
    wc3 = folded["w3b"].shape[1]
    assert wcin == wc3, "residual add requires matching channel counts"

    B = min(block_batch, N)
    assert N % B == 0, "batch must be divisible by the batch tile"
    grid = (N // B,)

    kernel = functools.partial(bottleneck_kernel, img_rows=H)
    const = lambda n: (0, 0)   # grid-invariant weights: fetched once

    return pl.pallas_call(
        kernel,
        out_shape=jax.ShapeDtypeStruct((total_rows, wc3), jnp.float32),
        grid_spec=pltpu.PrefetchScalarGridSpec(
            num_scalar_prefetch=0,
            grid=grid,
            in_specs=[
                pl.BlockSpec((B * H, wcin), lambda n: (n, 0)),
                pl.BlockSpec((wcin, wc1), const),
                pl.BlockSpec((1, wc1), const),
                pl.BlockSpec((1, wc1), const),
                pl.BlockSpec((wc1, 3 * wc2), const),
                pl.BlockSpec((1, wc2), const),
                pl.BlockSpec((1, wc2), const),
                pl.BlockSpec((wc2, wc3), const),
                pl.BlockSpec((1, wc3), const),
                pl.BlockSpec((1, wc3), const),
            ],
            out_specs=pl.BlockSpec((B * H, wc3), lambda n: (n, 0)),
        ),
        compiler_params=pltpu.CompilerParams(
            dimension_semantics=("parallel",)),
    )(x_rows, folded["w1b"], folded["s1b"], folded["b1b"],
      folded["w2cat"], folded["s2b"], folded["b2b"],
      folded["w3b"], folded["s3b"], folded["b3b"])


def nchw_to_rows(x_nchw):
    N, C, H, W = x_nchw.shape
    return jnp.transpose(x_nchw, (0, 2, 3, 1)).astype(jnp.float32).reshape(
        N * H, W * C)


def rows_to_nchw(rows, N, H, W):
    C = rows.shape[-1] // W
    return jnp.transpose(rows.reshape(N, H, W, C), (0, 3, 1, 2))


# --------------------------- synthetic params ---------------------------------
def init_params(key, inplanes, cfg, eps=1e-5):
    """Deterministic synthetic params. cfg = [conv1_out, conv2_out, conv3_out, conv1_in]."""
    c1, c2, c3, cin = cfg
    ks = list(jax.random.split(key, 19))

    def bn_gate_fold(kg, kb, km, kv, kgate, c):
        gamma = jax.random.uniform(kg, (c,), minval=0.5, maxval=1.5)
        beta = 0.1 * jax.random.normal(kb, (c,))
        mean = 0.1 * jax.random.normal(km, (c,))
        var = jax.random.uniform(kv, (c,), minval=0.5, maxval=1.5)
        gate = jax.random.uniform(kgate, (c,), minval=0.5, maxval=1.5)  # SparseGate
        inv = gamma / jnp.sqrt(var + eps)
        scale = gate * inv
        bias = gate * (beta - mean * inv)
        return scale.astype(jnp.float32), bias.astype(jnp.float32)

    s1, b1 = bn_gate_fold(ks[0], ks[1], ks[2], ks[3], ks[4], c1)
    s2, b2 = bn_gate_fold(ks[5], ks[6], ks[7], ks[8], ks[9], c2)
    s3, b3 = bn_gate_fold(ks[10], ks[11], ks[12], ks[13], ks[14], c3)
    w1 = (jax.random.normal(ks[15], (cin, c1)) / jnp.sqrt(cin)).astype(jnp.float32)
    w2 = (jax.random.normal(ks[16], (3, 3, c1, c2)) / jnp.sqrt(9 * c1)).astype(jnp.float32)
    w3 = (jax.random.normal(ks[17], (c2, c3)) / jnp.sqrt(c2)).astype(jnp.float32)
    ig = jax.random.uniform(ks[18], (cin,), minval=0.5, maxval=1.5).astype(jnp.float32)
    return dict(select_idx=jnp.arange(inplanes, dtype=jnp.int32)[:cin],
                ig=ig, w1=w1, s1=s1, b1=b1, w2=w2, s2=s2, b2=b2,
                w3=w3, s3=s3, b3=b3)


# ------------------------------ reference -------------------------------------
def reference_forward(x_nchw, p):
    """Pure-JAX f32 reference (lax.conv) with module semantics, for validation."""
    x = jnp.transpose(x_nchw, (0, 2, 3, 1)).astype(jnp.float32)
    residual = x
    out = jnp.take(x, p["select_idx"], axis=-1) * p["ig"]
    dn = ("NHWC", "HWIO", "NHWC")
    cin, c1 = p["w1"].shape
    out = lax.conv_general_dilated(out, p["w1"].reshape(1, 1, cin, c1),
                                   (1, 1), "VALID", dimension_numbers=dn)
    out = jnp.maximum(out * p["s1"] + p["b1"], 0.0)
    out = lax.conv_general_dilated(out, p["w2"], (1, 1), "SAME",
                                   dimension_numbers=dn)
    out = jnp.maximum(out * p["s2"] + p["b2"], 0.0)
    c2, c3 = p["w3"].shape
    out = lax.conv_general_dilated(out, p["w3"].reshape(1, 1, c2, c3),
                                   (1, 1), "VALID", dimension_numbers=dn)
    out = out * p["s3"] + p["b3"]
    out = jnp.maximum(out + residual, 0.0)
    return jnp.transpose(out, (0, 3, 1, 2))


if __name__ == "__main__":
    key = jax.random.PRNGKey(0)
    kx, kp = jax.random.split(key)

    # Bottleneck(inplanes=16, outplanes=16, cfg=[4,4,16,16], gate=True,
    #            stride=1, downsample=None, expand=False)
    N, inplanes, H, W = 16, 16, 8, 8
    cfg = [4, 4, 16, 16]   # [conv1_out, conv2_out, conv3_out, conv1_in]

    x = jax.random.normal(kx, (N, inplanes, H, W), jnp.float32)   # NCHW input
    params = init_params(kp, inplanes, cfg)

    # Hoisted, one-time weight folding (not inside the jitted forward).
    folded = fold_params(params, inplanes, W)

    # TODO(synk): in a full network the activations would stay in row-slab
    # layout between blocks; the NCHW<->rows conversion here exists only to
    # validate against the PyTorch-convention reference.
    fwd = jax.jit(functools.partial(bottleneck_forward_rows,
                                    img_rows=H, block_batch=4))
    x_rows = nchw_to_rows(x)
    out_rows = jax.block_until_ready(fwd(x_rows, folded))
    out = rows_to_nchw(out_rows, N, H, W)

    ref = reference_forward(x, params)
    assert out.shape == (N, cfg[2], H, W), out.shape
    max_err = float(jnp.max(jnp.abs(out - ref)))
    # bf16 MXU operands (f32 accumulate / f32 epilogue) => relaxed tolerance
    # vs. the all-f32 reference.
    assert jnp.allclose(out, ref, atol=5e-2, rtol=5e-2), max_err

    print("KERNEL_OK")
</pallas_src>

<mosaic_0001>
module attributes {stable_mosaic.version = 11 : i64} {
  func.func @bottleneck_kernel(%arg0: i32, %arg1: memref<32x128xf32, #tpu.memory_space<vmem>>, %arg2: memref<128x32xbf16, #tpu.memory_space<vmem>>, %arg3: memref<1x32xf32, #tpu.memory_space<vmem>>, %arg4: memref<1x32xf32, #tpu.memory_space<vmem>>, %arg5: memref<32x96xbf16, #tpu.memory_space<vmem>>, %arg6: memref<1x32xf32, #tpu.memory_space<vmem>>, %arg7: memref<1x32xf32, #tpu.memory_space<vmem>>, %arg8: memref<32x128xbf16, #tpu.memory_space<vmem>>, %arg9: memref<1x128xf32, #tpu.memory_space<vmem>>, %arg10: memref<1x128xf32, #tpu.memory_space<vmem>>, %arg11: memref<32x128xf32, #tpu.memory_space<vmem>>) attributes {dimension_semantics = [#tpu.dimension_semantics<parallel>], iteration_bounds = array<i64: 4>, scalar_prefetch = 0 : i64, scratch_operands = 0 : i64, tpu.core_type = #tpu.core_type<tc>, window_params = [{transform_indices = @transform_0, window_bounds = array<i64: 32, 128>}, {pipeline_mode = #tpu.pipeline_mode<synchronous>, transform_indices = @transform_1, window_bounds = array<i64: 128, 32>}, {pipeline_mode = #tpu.pipeline_mode<synchronous>, transform_indices = @transform_2, window_bounds = array<i64: 1, 32>}, {pipeline_mode = #tpu.pipeline_mode<synchronous>, transform_indices = @transform_3, window_bounds = array<i64: 1, 32>}, {pipeline_mode = #tpu.pipeline_mode<synchronous>, transform_indices = @transform_4, window_bounds = array<i64: 32, 96>}, {pipeline_mode = #tpu.pipeline_mode<synchronous>, transform_indices = @transform_5, window_bounds = array<i64: 1, 32>}, {pipeline_mode = #tpu.pipeline_mode<synchronous>, transform_indices = @transform_6, window_bounds = array<i64: 1, 32>}, {pipeline_mode = #tpu.pipeline_mode<synchronous>, transform_indices = @transform_7, window_bounds = array<i64: 32, 128>}, {pipeline_mode = #tpu.pipeline_mode<synchronous>, transform_indices = @transform_8, window_bounds = array<i64: 1, 128>}, {pipeline_mode = #tpu.pipeline_mode<synchronous>, transform_indices = @transform_9, window_bounds = array<i64: 1, 128>}, {transform_indices = @transform_10, window_bounds = array<i64: 32, 128>}]} {
    %c0 = arith.constant 0 : index
    %c0_0 = arith.constant 0 : index
    %0 = vector.load %arg1[%c0, %c0_0] : memref<32x128xf32, #tpu.memory_space<vmem>>, vector<32x128xf32>
    %1 = arith.truncf %0 : vector<32x128xf32> to vector<32x128xbf16>
    %c0_1 = arith.constant 0 : index
    %c0_2 = arith.constant 0 : index
    %2 = vector.load %arg2[%c0_1, %c0_2] : memref<128x32xbf16, #tpu.memory_space<vmem>>, vector<128x32xbf16>
    %cst = arith.constant dense<0.000000e+00> : vector<32x32xf32>
    %3 = tpu.matmul %1, %2, %cst {dimension_numbers = #tpu.dot_dimension_numbers<[1], [0], [0], [1], [0, 0, 1, 1], [], []>} : vector<32x128xbf16>, vector<128x32xbf16>, vector<32x32xf32> -> vector<32x32xf32>
    %c0_3 = arith.constant 0 : index
    %c0_4 = arith.constant 0 : index
    %4 = vector.load %arg3[%c0_3, %c0_4] : memref<1x32xf32, #tpu.memory_space<vmem>>, vector<1x32xf32>
    %5 = vector.broadcast %4 : vector<1x32xf32> to vector<32x32xf32>
    %6 = arith.mulf %3, %5 : vector<32x32xf32>
    %c0_5 = arith.constant 0 : index
    %c0_6 = arith.constant 0 : index
    %7 = vector.load %arg4[%c0_5, %c0_6] : memref<1x32xf32, #tpu.memory_space<vmem>>, vector<1x32xf32>
    %8 = vector.broadcast %7 : vector<1x32xf32> to vector<32x32xf32>
    %9 = arith.addf %6, %8 : vector<32x32xf32>
    %cst_7 = arith.constant 0.000000e+00 : f32
    %10 = vector.broadcast %cst_7 : f32 to vector<32x32xf32>
    %11 = arith.maximumf %9, %10 : vector<32x32xf32>
    %12 = arith.truncf %11 : vector<32x32xf32> to vector<32x32xbf16>
    %c0_8 = arith.constant 0 : index
    %c0_9 = arith.constant 0 : index
    %13 = vector.load %arg5[%c0_8, %c0_9] : memref<32x96xbf16, #tpu.memory_space<vmem>>, vector<32x96xbf16>
    %cst_10 = arith.constant dense<0.000000e+00> : vector<32x96xf32>
    %14 = tpu.matmul %12, %13, %cst_10 {dimension_numbers = #tpu.dot_dimension_numbers<[1], [0], [0], [1], [0, 0, 1, 1], [], []>} : vector<32x32xbf16>, vector<32x96xbf16>, vector<32x96xf32> -> vector<32x96xf32>
    %15 = vector.extract_strided_slice %14 {offsets = [0, 0], sizes = [32, 32], strides = [1, 1]} : vector<32x96xf32> to vector<32x32xf32>
    %16 = vector.extract_strided_slice %14 {offsets = [0, 32], sizes = [32, 32], strides = [1, 1]} : vector<32x96xf32> to vector<32x32xf32>
    %17 = vector.extract_strided_slice %14 {offsets = [0, 64], sizes = [32, 32], strides = [1, 1]} : vector<32x96xf32> to vector<32x32xf32>
    %18 = tpu.iota {dimensions = array<i32: 0>} : vector<32x32xi32>
    %c8_i32 = arith.constant 8 : i32
    %c0_i32 = arith.constant 0 : i32
    %19 = arith.cmpi eq, %c8_i32, %c0_i32 : i32
    %c1_i32 = arith.constant 1 : i32
    %20 = arith.select %19, %c1_i32, %c8_i32 : i32
    %21 = vector.broadcast %20 : i32 to vector<32x32xi32>
    %22 = arith.remsi %18, %21 : vector<32x32xi32>
    %c0_i32_11 = arith.constant 0 : i32
    %23 = vector.broadcast %c0_i32_11 : i32 to vector<32x32xi32>
    %24 = arith.cmpi ne, %22, %23 : vector<32x32xi32>
    %c0_i32_12 = arith.constant 0 : i32
    %25 = vector.broadcast %c0_i32_12 : i32 to vector<32x32xi32>
    %26 = arith.cmpi slt, %22, %25 : vector<32x32xi32>
    %c0_i32_13 = arith.constant 0 : i32
    %27 = arith.cmpi slt, %20, %c0_i32_13 : i32
    %28 = vector.broadcast %27 : i1 to vector<32x32xi1>
    %29 = vector.broadcast %28 : vector<32x32xi1> to vector<32x32xi1>
    %30 = arith.xori %26, %29 : vector<32x32xi1>
    %31 = arith.andi %30, %24 : vector<32x32xi1>
    %32 = vector.broadcast %20 : i32 to vector<32x32xi32>
    %33 = arith.addi %22, %32 : vector<32x32xi32>
    %34 = arith.select %31, %33, %22 : vector<32x32xi1>, vector<32x32xi32>
    %c0_i32_14 = arith.constant 0 : i32
    %35 = vector.broadcast %c0_i32_14 : i32 to vector<32x32xi32>
    %36 = arith.cmpi eq, %34, %35 : vector<32x32xi32>
    %c1_i32_15 = arith.constant 1 : i32
    %37 = tpu.dynamic_rotate %15 by %c1_i32_15 dim 0 : vector<32x32xf32>, i32 -> vector<32x32xf32>
    %cst_16 = arith.constant 0.000000e+00 : f32
    %38 = vector.broadcast %cst_16 : f32 to vector<32x32xf32>
    %39 = arith.select %36, %38, %37 : vector<32x32xi1>, vector<32x32xf32>
    %40 = arith.addf %16, %39 : vector<32x32xf32>
    %c7_i32 = arith.constant 7 : i32
    %41 = vector.broadcast %c7_i32 : i32 to vector<32x32xi32>
    %42 = arith.cmpi eq, %34, %41 : vector<32x32xi32>
    %c31_i32 = arith.constant 31 : i32
    %43 = tpu.dynamic_rotate %17 by %c31_i32 dim 0 : vector<32x32xf32>, i32 -> vector<32x32xf32>
    %cst_17 = arith.constant 0.000000e+00 : f32
    %44 = vector.broadcast %cst_17 : f32 to vector<32x32xf32>
    %45 = arith.select %42, %44, %43 : vector<32x32xi1>, vector<32x32xf32>
    %46 = arith.addf %40, %45 : vector<32x32xf32>
    %c0_18 = arith.constant 0 : index
    %c0_19 = arith.constant 0 : index
    %47 = vector.load %arg6[%c0_18, %c0_19] : memref<1x32xf32, #tpu.memory_space<vmem>>, vector<1x32xf32>
    %48 = vector.broadcast %47 : vector<1x32xf32> to vector<32x32xf32>
    %49 = arith.mulf %46, %48 : vector<32x32xf32>
    %c0_20 = arith.constant 0 : index
    %c0_21 = arith.constant 0 : index
    %50 = vector.load %arg7[%c0_20, %c0_21] : memref<1x32xf32, #tpu.memory_space<vmem>>, vector<1x32xf32>
    %51 = vector.broadcast %50 : vector<1x32xf32> to vector<32x32xf32>
    %52 = arith.addf %49, %51 : vector<32x32xf32>
    %cst_22 = arith.constant 0.000000e+00 : f32
    %53 = vector.broadcast %cst_22 : f32 to vector<32x32xf32>
    %54 = arith.maximumf %52, %53 : vector<32x32xf32>
    %55 = arith.truncf %54 : vector<32x32xf32> to vector<32x32xbf16>
    %c0_23 = arith.constant 0 : index
    %c0_24 = arith.constant 0 : index
    %56 = vector.load %arg8[%c0_23, %c0_24] : memref<32x128xbf16, #tpu.memory_space<vmem>>, vector<32x128xbf16>
    %cst_25 = arith.constant dense<0.000000e+00> : vector<32x128xf32>
    %57 = tpu.matmul %55, %56, %cst_25 {dimension_numbers = #tpu.dot_dimension_numbers<[1], [0], [0], [1], [0, 0, 1, 1], [], []>} : vector<32x32xbf16>, vector<32x128xbf16>, vector<32x128xf32> -> vector<32x128xf32>
    %c0_26 = arith.constant 0 : index
    %c0_27 = arith.constant 0 : index
    %58 = vector.load %arg9[%c0_26, %c0_27] : memref<1x128xf32, #tpu.memory_space<vmem>>, vector<1x128xf32>
    %59 = vector.broadcast %58 : vector<1x128xf32> to vector<32x128xf32>
    %60 = arith.mulf %57, %59 : vector<32x128xf32>
    %c0_28 = arith.constant 0 : index
    %c0_29 = arith.constant 0 : index
    %61 = vector.load %arg10[%c0_28, %c0_29] : memref<1x128xf32, #tpu.memory_space<vmem>>, vector<1x128xf32>
    %62 = vector.broadcast %61 : vector<1x128xf32> to vector<32x128xf32>
    %63 = arith.addf %60, %62 : vector<32x128xf32>
    %64 = arith.addf %63, %0 : vector<32x128xf32>
    %cst_30 = arith.constant 0.000000e+00 : f32
    %65 = vector.broadcast %cst_30 : f32 to vector<32x128xf32>
    %66 = arith.maximumf %64, %65 : vector<32x128xf32>
    %c0_31 = arith.constant 0 : index
    %c0_32 = arith.constant 0 : index
    %67 = vector.load %arg11[%c0_31, %c0_32] : memref<32x128xf32, #tpu.memory_space<vmem>>, vector<32x128xf32>
    tpu.vector_store %arg11[%c0_31, %c0_32], %66 {strides = array<i32>} : memref<32x128xf32, #tpu.memory_space<vmem>>, vector<32x128xf32>,
    return
  }
  func.func @transform_0(%arg0: i32) -> (i32, i32) {
    %c0_i32 = arith.constant 0 : i32
    %c0_i32_0 = arith.constant 0 : i32
    return %arg0, %c0_i32 : i32, i32
  }
  func.func @transform_1(%arg0: i32) -> (i32, i32) {
    %c0_i32 = arith.constant 0 : i32
    %c0_i32_0 = arith.constant 0 : i32
    %c0_i32_1 = arith.constant 0 : i32
    return %c0_i32, %c0_i32_0 : i32, i32
  }
  func.func @transform_2(%arg0: i32) -> (i32, i32) {
    %c0_i32 = arith.constant 0 : i32
    %c0_i32_0 = arith.constant 0 : i32
    %c0_i32_1 = arith.constant 0 : i32
    return %c0_i32, %c0_i32_0 : i32, i32
  }
  func.func @transform_3(%arg0: i32) -> (i32, i32) {
    %c0_i32 = arith.constant 0 : i32
    %c0_i32_0 = arith.constant 0 : i32
    %c0_i32_1 = arith.constant 0 : i32
    return %c0_i32, %c0_i32_0 : i32, i32
  }
  func.func @transform_4(%arg0: i32) -> (i32, i32) {
    %c0_i32 = arith.constant 0 : i32
    %c0_i32_0 = arith.constant 0 : i32
    %c0_i32_1 = arith.constant 0 : i32
    return %c0_i32, %c0_i32_0 : i32, i32
  }
  func.func @transform_5(%arg0: i32) -> (i32, i32) {
    %c0_i32 = arith.constant 0 : i32
    %c0_i32_0 = arith.constant 0 : i32
    %c0_i32_1 = arith.constant 0 : i32
    return %c0_i32, %c0_i32_0 : i32, i32
  }
  func.func @transform_6(%arg0: i32) -> (i32, i32) {
    %c0_i32 = arith.constant 0 : i32
    %c0_i32_0 = arith.constant 0 : i32
    %c0_i32_1 = arith.constant 0 : i32
    return %c0_i32, %c0_i32_0 : i32, i32
  }
  func.func @transform_7(%arg0: i32) -> (i32, i32) {
    %c0_i32 = arith.constant 0 : i32
    %c0_i32_0 = arith.constant 0 : i32
    %c0_i32_1 = arith.constant 0 : i32
    return %c0_i32, %c0_i32_0 : i32, i32
  }
  func.func @transform_8(%arg0: i32) -> (i32, i32) {
    %c0_i32 = arith.constant 0 : i32
    %c0_i32_0 = arith.constant 0 : i32
    %c0_i32_1 = arith.constant 0 : i32
    return %c0_i32, %c0_i32_0 : i32, i32
  }
  func.func @transform_9(%arg0: i32) -> (i32, i32) {
    %c0_i32 = arith.constant 0 : i32
    %c0_i32_0 = arith.constant 0 : i32
    %c0_i32_1 = arith.constant 0 : i32
    return %c0_i32, %c0_i32_0 : i32, i32
  }
  func.func @transform_10(%arg0: i32) -> (i32, i32) {
    %c0_i32 = arith.constant 0 : i32
    %c0_i32_0 = arith.constant 0 : i32
    return %arg0, %c0_i32 : i32, i32
  }
}

</mosaic_0001>

<bundles_post_ra>
// kernel: bottleneck_forward_rows.1
= control target key start
LH: loop header
LB: loop body
LE: loop exit
PB: predicated region body
PF: predicated region fallthrough
CT: control target
= control target key end

     0   :  { %15 = vsyncpa [#allocation3], 0  ;;  %s1433_s0 = inlined_call_operand.hbm [shape: f32[128,128], index: 0, kind: input, shape index: {}]   ;;  %s1434_s1 = inlined_call_operand.vmem [shape: bf16[128,32], index: 1, kind: input, shape index: {}]   ;;  %s1435_s2 = inlined_call_operand.vmem [shape: f32[1,32], index: 2, kind: input, shape index: {}]   ;;  %s1436_s3 = inlined_call_operand.vmem [shape: f32[1,32], index: 3, kind: input, shape index: {}]   ;;  %s1437_s4 = inlined_call_operand.vmem [shape: bf16[32,96], index: 4, kind: input, shape index: {}]   ;;  %s1438_s5 = inlined_call_operand.vmem [shape: f32[1,32], index: 5, kind: input, shape index: {}]   ;;  %s1439_s6 = inlined_call_operand.vmem [shape: f32[1,32], index: 6, kind: input, shape index: {}]   ;;  %s1440_s7 = inlined_call_operand.vmem [shape: bf16[32,128], index: 7, kind: input, shape index: {}]   ;;  %s1441_s8 = inlined_call_operand.vmem [shape: f32[1,128], index: 8, kind: input, shape index: {}]   ;;  %s1442_s9 = inlined_call_operand.vmem [shape: f32[1,128], index: 9, kind: input, shape index: {}]   ;;  %s1443_s10 = inlined_call_operand.hbm [shape: f32[128,128], index: 10, kind: output, shape index: {}]  }
   0x1   :  { %17 = vsyncpa [#allocation3 + $0x1], 0 }
   0x2   :  { %18 = vsyncpa [#allocation4], 0 }
   0x3   :  { %20 = vsyncpa [#allocation4 + $0x1], 0  ;;  %s1176_s13 = smov 0   ;;  %s1178_s14 = smov 0  }
   0x4   :  { %s1180_s15 = smov 0   ;;  %s1182_s16 = smov 0  }
   0x5 LB: > { %1448 = sst [smem:[#allocation8_spill]] %s1108_s15  ;;  %s1197_s17 = sadd.s32 4294967295, %s1112_s16   ;;  %s1112_s16 = sphi %s1182_s16, %s1458_s16   ;;  %s1108_s15 = sphi %s1180_s15, %s1460_s15   ;;  %s1104_s14 = sphi %s1178_s14, %s1462_s14   ;;  %s1100_s13 = sphi %s1176_s13, %s1461_s13  }
   0x6   : > { %s869_s18 = sadd.s32 4294967294, %s1112_s16   ;;  %s1201_s19 = sadd.s32 1, %s1112_s16  }
   0x7   : > { %1449 = sst [smem:[#allocation9_spill]] %s1201_s19  ;;  %s33_s20 = sadd.s32 1, %s1108_s15 }
   0x8   : > { %s30_s21 = ssub.s32 %s1112_s16, %s1201_s19  ;;  %p40_p0 = scmp.ne.s32.totalorder %s1108_s15, %s1104_s14 }
   0x9   : > { %p31_p1 = scmp.eq.s32.totalorder %s30_s21, 0  ;;  %p41_p2 = scmp.eq.s32.totalorder %s1112_s16, 0 }
   0xa   : > { %p46_p3 = scmp.ne.s32.totalorder %s1104_s14, %s1100_s13  ;;  %p47_p4 = scmp.eq.s32.totalorder %s1197_s17, 0 }
   0xb   : > { %s1213_s22 = scalar_select %p31_p1, %s1108_s15, %s33_s20  }
   0xc   : > { %p1215_p5 = por %p41_p2, %p40_p0  ;;  %p1219_p6 = por %p47_p4, %p46_p3 }
   0xd   : > { %1450 = sst [smem:[#allocation10_spill]] %s1213_s22  ;;  %p259_p7 = scmp.eq.s32.totalorder %s1197_s17, 3 }
   0xe   : > { %p265_p8 = scmp.eq.s32.totalorder %s869_s18, 3  ;;  %p969_p9 = scmp.lt.s32.totalorder %s1112_s16, 4 }
   0xf   : > { %p1225_p10 = por %p259_p7, %p40_p0  ;;  %s312_s27 = sand.u32 1, %s1108_s15  }
  0x10   : > { %p1229_p11 = por %p265_p8, %p46_p3  ;;  %s935_s28 = sshll.u32 %s1112_s16, 5 }
  0x11   : > { %s872_s29 = sshll.u32 %s312_s27, 5  ;;  %s321_s12 = scalar_lea.hbm %s1433_s0, %s935_s28 }
  0x12   : > { %s1454_s26 = scalar_select %p1229_p11, 1, 0 }
  0x13   : > { %s322_s20 = sshll.u32 %s321_s12, 4  ;;  %s316_s21 = scalar_lea.vmem [#allocation2], %s872_s29  ;;  %s323_s20 = int_to_ptr.hbm [resolvable:$true] %s322_s20 }
  0x14   : > { %1455 = sst [smem:[#allocation11_spill]] %s1454_s26  ;;  %s324_s22 = sshll.u32 %s316_s21, 4  ;;  %s325_s22 = int_to_ptr.vmem [resolvable:$true] %s324_s22 }
  0x15   : > { %p1240_p12 = pnand %p969_p9, %p1215_p5  ;;  %p875_p13 = scmp.ge.s32.totalorder %s1112_s16, 1 }
  0x16   : > { %p332_p0 = scmp.lt.s32.totalorder %s1112_s16, 5  ;;  %s313_s15 = scalar_lea.sflag [#allocation3], %s312_s27 }
  0x17   : > { %s1016_s19 = sshra.s32 %s323_s20, 4  ;;  %p1020_p2 = pneg %p1240_p12  ;;  %s1017_s19 = int_to_ptr.hbm [resolvable:$true] %s1016_s19 }
  0x18   : > { %s1018_s26 = scalar_lea.hbm %s1017_s19, 32  ;;  %s1023_s23 = scalar_lea.hbm %s1433_s0, 128 }
  0x19   : > { %p1019_p1 = scmp.ne.s32.totalorder %s1017_s19, %s1018_s26  ;;  %p1024_p5 = scmp.lt.s32.totalorder %s1017_s19, %s1433_s0 }
  0x1a   : > { %p1025_p7 = scmp.lt.s32.totalorder %s1023_s23, %s1018_s26 }
  0x1b   : > { %p1021_p3 = pnand %p1020_p2, %p1019_p1 }
  0x1c   : > { %p1026_p8 = por %p1025_p7, %p1024_p5 }
  0x1d   : > { %p1022_p4 = pneg %p1021_p3 }
  0x1f   : > { %p1027_p9 = pnand %p1026_p8, %p1022_p4 }
  0x21   : > { %1030 = shalt.err (!%p1027_p9)
}
  0x22   : > { %s1114_s27 = smov 128   ;;  %s1115_s12 = smov 8  }
  0x23   : > { %964 = dma.hbm_to_vmem [thread:$0]  (!%p1240_p12), %s323_s20, 512, %s325_s22, %s313_s15, %s1114_s27, %s1114_s27, %s1115_s12  }
  0x24   : > { %p333_p1 = pnand %p875_p13, %p332_p0 }
  0x25   : > { %s1261_s21 = sand.u32 (!%p333_p1), 1, %s1104_s14  }
  0x26   : > { %336 = sbr.rel (%p333_p1) target bundleno = 887 (0x377), region = 60  ;;  %s876_s19 = sshll.u32 (!%p333_p1), %s1261_s21, 5 }
  0x27   : > { %s339_s26 = scalar_lea.sflag (!%p333_p1), [#allocation3], %s1261_s21  ;;  %s342_s28 = scalar_lea.vmem (!%p333_p1), [#allocation2], %s876_s19 }
  0x2b   : > { %1091 = dma.done.wait (%p1219_p6), %s339_s26, 512  }
  0x2c   : > { %1093 = vsyncadd (%p1219_p6), %s339_s26, 4294966784  ;;  %v943_v0 = vld [vmem:[%s1434_s1 + $0x38] sm:$0xff]  ;;  %v942_v1 = vld [vmem:[%s1434_s1 + $0x30] sm:$0xff]  ;;  %vm510_vm0 = vcmask 261120   ;;  %v536_v36 = vlaneseq  ;;  %s1116_s26 = smov 64   ;;  %s1117_s15 = smov 32  }
  0x2d   : > { %453 = vmatpush.bf16.msra.mxu0 %v943_v0  ;;  %949 = vmatpush.bf16.msra.mxu3 %v943_v0  ;;  %v941_v2 = vld [vmem:[%s1434_s1 + $0x28] sm:$0xff]  ;;  %v940_v3 = vld [vmem:[%s1434_s1 + $0x20] sm:$0xff]  ;;  %v939_v4 = vld [vmem:[%s1434_s1 + $0x18] sm:$0xff]  ;;  %s1118_s11 = smov 96   ;;  %s379_s22 = scalar_lea.vmem [#allocation5], %s876_s19 }
  0x2e   : > { %v938_v5 = vld [vmem:[%s1434_s1 + $0x10] sm:$0xff]  ;;  %v937_v6 = vld [vmem:[%s1434_s1 + $0x8] sm:$0xff]  ;;  %v936_v7 = vld [vmem:[%s1434_s1] sm:$0xff]  ;;  %v1321_v37 = vshrl.u32 %v536_v36, 7  ;;  %s948_s20 = sshll.u32 %s1197_s17, 5  ;;  %s793_s23 = sshll.u32 %s379_s22, 4  ;;  %s794_s23 = int_to_ptr.vmem [resolvable:$true] %s793_s23 }
  0x2f   : > { %v1295_v8 = vld [vmem:[%s342_s28] sm:$0xff]  ;;  %v1297_v9 = vld [vmem:[%s342_s28 + $0x8] sm:$0xff]  ;;  %v1299_v10 = vld [vmem:[%s342_s28 + $0x10] sm:$0xff]  ;;  %s792_s19 = scalar_lea.hbm %s1443_s10, %s948_s20  ;;  %s781_s30 = scalar_lea.sflag [#allocation4], %s1261_s21 }
  0x30   : > { %v1301_v11 = vld [vmem:[%s342_s28 + $0x18] sm:$0xff]  ;;  %v387_v12 = vpack.c.bf16 %v1297_v9, %v1295_v8  ;;  %v945_v14 = vld [vmem:[%s1437_s4 + $0x8] sm:$0xff]  ;;  %v944_v15 = vld [vmem:[%s1437_s4] sm:$0xff]  ;;  %v538_v39 = vadd.s32 8, %v1321_v37  ;;  %vm597_vm1 = vcmp.lt.s32.totalorder %v1321_v37, 1  ;;  %v545_v49 = vand.u32 7, %v1321_v37 }
  0x31   : > { %454 = vmatpush.bf16.msra.mxu0 %v942_v1  ;;  %950 = vmatpush.bf16.msra.mxu3 %v942_v1  ;;  %v388_v13 = vpack.c.bf16 %v1301_v11, %v1299_v10  ;;  %v1010_v17 = vld [vmem:[%s1435_s2] ss:$0 sm:$0xff]  ;;  %v540_v55 = vadd.s32 24, %v1321_v37  ;;  %vm650_vm5 = vcmp.lt.s32.totalorder %v1321_v37, 7  ;;  %s795_s24 = sshll.u32 %s792_s19, 4  ;;  %s1066_s12 = scalar_lea.hbm %s1443_s10, 128  ;;  %s796_s24 = int_to_ptr.hbm [resolvable:$true] %s795_s24 }
  0x32   : > { %523 = vmatpush.bf16.msra.mxu1 %v945_v14  ;;  %v1011_v19 = vld [vmem:[%s1436_s3] ss:$0 sm:$0xff]  ;;  %v552_v40 = vand.u32 7, %v538_v39  ;;  %vm589_vm3 = vcmp.eq.s32.totalorder %v545_v49, 0  ;;  %vm626_vm6 = vcmp.eq.s32.totalorder %v545_v49, 7  ;;  %s1060_s17 = sshra.s32 %s796_s24, 4  ;;  %s1061_s17 = int_to_ptr.hbm [resolvable:$true] %s1060_s17 }
  0x33   : > { %v1012_v54 = vld [vmem:[%s1438_s5] ss:$0 sm:$0xff]  ;;  %v566_v56 = vand.u32 7, %v540_v55  ;;  %s1062_s28 = scalar_lea.hbm %s1061_s17, 32  ;;  %p1067_p0 = scmp.lt.s32.totalorder %s1061_s17, %s1443_s10 }
  0x34   : > { %vm590_vm2 = vcmp.eq.s32.totalorder %v552_v40, 0  ;;  %vm627_vm7 = vcmp.eq.s32.totalorder %v552_v40, 7  ;;  %p1063_p6 = scmp.ne.s32.totalorder %s1061_s17, %s1062_s28  ;;  %p1068_p2 = scmp.lt.s32.totalorder %s1066_s12, %s1062_s28 }
  0x35   : > { %455 = vmatpush.bf16.msra.mxu0 %v941_v2  ;;  %951 = vmatpush.bf16.msra.mxu3 %v941_v2  ;;  %vm592_vm4 = vcmp.eq.s32.totalorder %v566_v56, 0  ;;  %vm629_vm10 = vcmp.eq.s32.totalorder %v566_v56, 7  ;;  %v1015_v56 = vld [vmem:[%s1442_s9] ss:$0 sm:$0xff] }
  0x36   : > { %524 = vmatpush.bf16.msra.mxu1 %v944_v15  ;;  %p1064_p12 = pnand %p1063_p6, %p1225_p10  ;;  %p1069_p3 = por %p1068_p2, %p1067_p0 }
  0x38   : > { %p1065_p13 = pneg %p1064_p12 }
  0x39   : > { %456 = vmatpush.bf16.msra.mxu0 %v940_v3  ;;  %952 = vmatpush.bf16.msra.mxu3 %v940_v3  ;;  %v1013_v3 = vld [vmem:[%s1439_s6] ss:$0 sm:$0xff] }
  0x3a   : > { %p1070_p4 = pnand %p1069_p3, %p1065_p13 }
  0x3d   : > { %457 = vmatpush.bf16.msra.mxu0 %v939_v4  ;;  %953 = vmatpush.bf16.msra.mxu3 %v939_v4  ;;  %v539_v4 = vadd.s32 16, %v1321_v37 }
  0x41   : > { %458 = vmatpush.bf16.msra.mxu0 %v938_v5  ;;  %954 = vmatpush.bf16.msra.mxu3 %v938_v5 }
  0x45   : > { %459 = vmatpush.bf16.msra.mxu0 %v937_v6  ;;  %955 = vmatpush.bf16.msra.mxu3 %v937_v6 }
  0x49   : > { %460 = vmatpush.bf16.msra.mxu0 %v936_v7  ;;  %956 = vmatpush.bf16.msra.mxu3 %v936_v7  ;;  %v559_v7 = vand.u32 7, %v539_v4 }
  0x4b   : > { %vm591_vm8 = vcmp.eq.s32.totalorder %v559_v7, 0  ;;  %vm628_vm9 = vcmp.eq.s32.totalorder %v559_v7, 7 }
  0x4c   : > { %461 = vmatmul.bf16.vlgmr.msra.gmra.mxu0 %v387_v12  ;;  %466 = vmatmul.bf16.vlgmr.msra.gmra.mxu3 %v388_v13 }
  0xc9   : > { %v462_v16 = vpop.f32.mrf.mxu0 }
  0xca   : > { %v476_v18 = vmul.f32 %v1010_v17, %v462_v16 }
  0xcc   : > { %v484_v22 = vadd.f32 %v1011_v19, %v476_v18 }
  0xce   : > { %v488_v25 = vmax.f32 %v484_v22, 0.0 }
  0xcf   : > { %v467_v20 = vpop.f32.mrf.mxu3 }
  0xd0   : > { %v478_v29 = vmul.f32 %v1010_v17, %v467_v20 }
  0xd1   : > { %v464_v21 = vpop.f32.mrf.mxu0 }
  0xd2   : > { %v477_v23 = vmul.f32 %v1010_v17, %v464_v21  ;;  %v486_v31 = vadd.f32 %v1011_v19, %v478_v29 }
  0xd4   : > { %v485_v24 = vadd.f32 %v1011_v19, %v477_v23  ;;  %v490_v33 = vmax.f32 %v486_v31, 0.0  ;;  %v947_v23 = vld [vmem:[%s1440_s7 + $0x8] sm:$0xff] }
  0xd5   : > { %739 = vmatpush.bf16.msra.mxu2 %v947_v23 }
  0xd6   : > { %v489_v26 = vmax.f32 %v485_v24, 0.0 }
  0xd7   : > { %v469_v28 = vpop.f32.mrf.mxu3 }
  0xd8   : > { %v492_v27 = vpack.c.bf16 %v489_v26, %v488_v25  ;;  %v479_v30 = vmul.f32 %v1010_v17, %v469_v28  ;;  %v946_v25 = vld [vmem:[%s1440_s7] sm:$0xff] }
  0xd9   : > { %740 = vmatpush.bf16.msra.mxu2 %v946_v25 }
  0xda   : > { %918 = vmatmul.msk.bf16.vlgmr.msra.gmra.mxu1 %vm510_vm0, %v492_v27  ;;  %v487_v32 = vadd.f32 %v1011_v19, %v479_v30 }
  0xdc   : > { %v491_v34 = vmax.f32 %v487_v32, 0.0 }
  0xde   : > { %v493_v35 = vpack.c.bf16 %v491_v34, %v490_v33 }
  0xea   : > { %919 = vmatmul.msk.bf16.gmra.mxu1 %vm510_vm0, %v493_v35 }
 0x157   : > { %v1323_v38 = vpop.f32.mrf.mxu1 }
 0x158   : > { %634 = vrot.lane.b32.xlu0 %v1323_v38, %s1116_s26  ;;  %v593_v42 = vrot.slane %v1323_v38, 7 }
 0x15f   : > { %v1327_v41 = vpop.f32.mrf.mxu1 }
 0x160   : > { %v594_v43 = vrot.slane %v1327_v41, 7  ;;  %636 = vrot.lane.b32.xlu0 %v1327_v41, %s1116_s26 }
 0x162   : > { %v600_v44 = vsel %vm597_vm1, %v593_v42, %v594_v43 }
 0x163   : > { %v603_v45 = vsel %vm590_vm2, 0.0, %v600_v44 }
 0x164   : > { %612 = vrot.lane.b32.xlu2 %v603_v45, %s1117_s15 }
 0x167   : > { %v1336_v46 = vpop.f32.mrf.mxu1 }
 0x168   : > { %v595_v47 = vrot.slane %v1336_v46, 7  ;;  %638 = vrot.lane.b32.xlu1 %v1336_v46, %s1116_s26 }
 0x16a   : > { %v599_v48 = vsel %vm597_vm1, %v594_v43, %v595_v47 }
 0x16b   : > { %v604_v15 = vsel %vm591_vm8, 0.0, %v599_v48 }
 0x16f   : > { %v1343_v50 = vpop.f32.mrf.mxu1 }
 0x170   : > { %v596_v51 = vrot.slane %v1343_v50, 7  ;;  %640 = vrot.lane.b32.xlu1 %v1343_v50, %s1116_s26 }
 0x172   : > { %v601_v52 = vsel %vm597_vm1, %v596_v51, %v593_v42  ;;  %v598_v57 = vsel %vm597_vm1, %v595_v47, %v596_v51 }
 0x173   : > { %v602_v53 = vsel %vm589_vm3, 0.0, %v601_v52  ;;  %v605_v58 = vsel %vm592_vm4, 0.0, %v598_v57 }
 0x174   : > { %610 = vrot.lane.b32.xlu2 %v602_v53, %s1117_s15 }
 0x17c   : > { %682 = vrot.lane.b32.xlu2 %v1012_v54, %s1117_s15 }
 0x184   : > { %616 = vrot.lane.b32.xlu2 %v605_v58, %s1117_s15 }
 0x1be   : > { %v613_v19 = vpop.permute.xlu2 %612 }
 0x1bf   : > { %v623_v26 = vadd.f32 %v613_v19, %v1327_v41 }
 0x1ca   : > { %v635_v59 = vpop.permute.xlu0 %634 }
 0x1cb   : > { %v646_v61 = vrot.slane %v635_v59, 1 }
 0x1ce   : > { %v611_v20 = vpop.permute.xlu2 %610 }
 0x1cf   : > { %v622_v22 = vadd.f32 %v611_v20, %v1323_v38 }
 0x1d2   : > { %v637_v60 = vpop.permute.xlu0 %636 }
 0x1d3   : > { %v647_v62 = vrot.slane %v637_v60, 1 }
 0x1d5   : > { %v653_v63 = vsel %vm650_vm5, %v646_v61, %v647_v62 }
 0x1d6   : > { %v655_v0 = vsel %vm626_vm6, 0.0, %v653_v63  ;;  %v683_v27 = vpop.permute.xlu2 %682 }
 0x1d7   : > { %663 = vrot.lane.b32.xlu0 %v655_v0, %s1117_s15 }
 0x1da   : > { %v639_v1 = vpop.permute.xlu1 %638 }
 0x1db   : > { %v648_v2 = vrot.slane %v639_v1, 1 }
 0x1dd   : > { %v652_v5 = vsel %vm650_vm5, %v647_v62, %v648_v2 }
 0x1de   : > { %v656_v6 = vsel %vm627_vm7, 0.0, %v652_v5  ;;  %v617_v41 = vpop.permute.xlu2 %616 }
 0x1df   : > { %692 = vrot.lane.b32.xlu0 %v1013_v3, %s1117_s15  ;;  %665 = vrot.lane.b32.xlu1 %v656_v6, %s1117_s15  ;;  %v625_v43 = vadd.f32 %v617_v41, %v1343_v50  ;;  %v1014_v50 = vld [vmem:[%s1441_s8] ss:$0 sm:$0xff] }
 0x1e2   : > { %v641_v12 = vpop.permute.xlu1 %640 }
 0x1e3   : > { %v649_v13 = vrot.slane %v641_v12, 1 }
 0x1e5   : > { %v651_v14 = vsel %vm650_vm5, %v648_v2, %v649_v13  ;;  %v654_v17 = vsel %vm650_vm5, %v649_v13, %v646_v61 }
 0x1e6   : > { %v657_v16 = vsel %vm628_vm9, 0.0, %v651_v14  ;;  %v658_v18 = vsel %vm629_vm10, 0.0, %v654_v17 }
 0x1e7   : > { %614 = vrot.lane.b32.xlu1 %v604_v15, %s1117_s15  ;;  %667 = vrot.lane.b32.xlu0 %v657_v16, %s1117_s15 }
 0x1ef   : > { %669 = vrot.lane.b32.xlu1 %v658_v18, %s1117_s15 }
 0x249   : > { %v664_v21 = vpop.permute.xlu0 %663 }
 0x24a   : > { %v675_v24 = vadd.f32 %v664_v21, %v622_v22 }
 0x24c   : > { %v685_v30 = vmul.f32 %v683_v27, %v675_v24 }
 0x251   : > { %v693_v28 = vpop.permute.xlu0 %692  ;;  %v666_v29 = vpop.permute.xlu1 %665 }
 0x252   : > { %v676_v31 = vadd.f32 %v666_v29, %v623_v26  ;;  %v695_v32 = vadd.f32 %v693_v28, %v685_v30 }
 0x254   : > { %v686_v33 = vmul.f32 %v683_v27, %v676_v31  ;;  %v699_v36 = vmax.f32 %v695_v32, 0.0 }
 0x256   : > { %v696_v34 = vadd.f32 %v693_v28, %v686_v33 }
 0x258   : > { %v700_v35 = vmax.f32 %v696_v34, 0.0 }
 0x259   : > { %v615_v37 = vpop.permute.xlu1 %614  ;;  %v668_v40 = vpop.permute.xlu0 %667 }
 0x25a   : > { %v624_v38 = vadd.f32 %v615_v37, %v1336_v46  ;;  %v703_v39 = vpack.c.bf16 %v700_v35, %v699_v36 }
 0x25c   : > { %v677_v42 = vadd.f32 %v668_v40, %v624_v38  ;;  %711 = vrot.lane.b32.xlu2 %v703_v39, %s1118_s11 }
 0x25e   : > { %v687_v44 = vmul.f32 %v683_v27, %v677_v42 }
 0x260   : > { %v697_v49 = vadd.f32 %v693_v28, %v687_v44 }
 0x261   : > { %v670_v45 = vpop.permute.xlu1 %669 }
 0x262   : > { %v678_v47 = vadd.f32 %v670_v45, %v625_v43  ;;  %v701_v53 = vmax.f32 %v697_v49, 0.0 }
 0x264   : > { %v688_v48 = vmul.f32 %v683_v27, %v678_v47 }
 0x266   : > { %v698_v51 = vadd.f32 %v693_v28, %v688_v48 }
 0x268   : > { %v702_v52 = vmax.f32 %v698_v51, 0.0 }
 0x26a   : > { %v704_v54 = vpack.c.bf16 %v702_v52, %v701_v53 }
 0x26c   : > { %713 = vrot.lane.b32.xlu0 %v704_v54, %s1118_s11 }
 0x2b6   : > { %v712_v46 = vpop.permute.xlu2 %711 }
 0x2b7   : > { %928 = vmatmul.msk.bf16.vlgmr.msra.gmra.mxu2 %vm510_vm0, %v712_v46 }
 0x2de   : > { %v714_v55 = vpop.permute.xlu0 %713 }
 0x2df   : > { %929 = vmatmul.msk.bf16.gmra.mxu2 %vm510_vm0, %v714_v55 }
 0x33a   : > { %v742_v57 = vpop.f32.mrf.mxu2 }
 0x33b   : > { %v756_v58 = vmul.f32 %v1014_v50, %v742_v57 }
 0x33d   : > { %v764_v59 = vadd.f32 %v1015_v56, %v756_v58 }
 0x33f   : > { %v768_v60 = vadd.f32 %v764_v59, %v1295_v8 }
 0x341   : > { %v772_v61 = vmax.f32 %v768_v60, 0.0 }
 0x342   : > { %v744_v62 = vpop.f32.mrf.mxu2 }
 0x343   : > { %776 = vst [vmem:[%s379_s22] sm:$0xff] %v772_v61  ;;  %v757_v63 = vmul.f32 %v1014_v50, %v744_v62 }
 0x345   : > { %v765_v0 = vadd.f32 %v1015_v56, %v757_v63 }
 0x347   : > { %v769_v1 = vadd.f32 %v765_v0, %v1297_v9 }
 0x349   : > { %v773_v2 = vmax.f32 %v769_v1, 0.0 }
 0x34b   : > { %777 = vst [vmem:[%s379_s22 + $0x8] sm:$0xff] %v773_v2 }
 0x362   : > { %v747_v3 = vpop.f32.mrf.mxu2 }
 0x363   : > { %v758_v4 = vmul.f32 %v1014_v50, %v747_v3 }
 0x365   : > { %v766_v5 = vadd.f32 %v1015_v56, %v758_v4 }
 0x367   : > { %v770_v6 = vadd.f32 %v766_v5, %v1299_v10 }
 0x369   : > { %v774_v7 = vmax.f32 %v770_v6, 0.0 }
 0x36a   : > { %v749_v8 = vpop.f32.mrf.mxu2 }
 0x36b   : > { %778 = vst [vmem:[%s379_s22 + $0x10] sm:$0xff] %v774_v7  ;;  %v759_v12 = vmul.f32 %v1014_v50, %v749_v8 }
 0x36d   : > { %v767_v9 = vadd.f32 %v1015_v56, %v759_v12 }
 0x36f   : > { %v771_v13 = vadd.f32 %v767_v9, %v1301_v11 }
 0x371   : > { %v775_v14 = vmax.f32 %v771_v13, 0.0 }
 0x373   : > { %779 = vst [vmem:[%s379_s22 + $0x18] sm:$0xff] %v775_v14 }
 0x374   : > { %1073 = shalt.err (!%p1070_p4)
}
 0x375   : > { %s1119_s21 = smov 128   ;;  %s1120_s22 = smov 8  }
 0x376   : > { %959 = dma.vmem_to_hbm [thread:$0]  (%p1225_p10), %s794_s23, 512, %s796_s24, %s781_s30, %s1119_s21, %s1119_s21, %s1120_s22  }
 0x377 PF: > { %p970_p5 = scmp.ge.s32.totalorder %s1112_s16, 2  ;;  %s810_s18 = sand.u32 1, %s1100_s13  }
 0x378   : > { %s811_s29 = scalar_lea.sflag [#allocation4], %s810_s18 }
 0x379   : > { %p966_p7 = pnand %p970_p5, %p1229_p11 }
 0x37b   : > { %p967_p8 = pneg %p966_p7 }
 0x37d   : > { %1095 = dma.done.wait (%p967_p8), %s811_s29, 512  }
 0x37e   : > { %1097 = vsyncadd (%p967_p8), %s811_s29, 4294966784  ;;  %s1458_s16 = sld [smem:[#allocation9_spill]]  ;;  %s1461_s13 = smov %s1104_s14 }
 0x37f   : > { %s1459_s19 = sld [smem:[#allocation8_spill]] }
 0x380   : > { %s1460_s15 = sld [smem:[#allocation10_spill]] }
 0x384   : > { %p23_p9 = scmp.ge.s32.totalorder %s1458_s16, 6  }
 0x385   : > { %s1462_s14 = smov %s1459_s19 }
 0x386   :  { %25 = sbr.rel (!%p23_p9) target bundleno = 5 (0x5), region = 105 }
 0x38b   :  { %817 = vsyncpa [#allocation3], 1 }
 0x38c   :  { %819 = vsyncpa [#allocation3 + $0x1], 1 }
 0x38d   :  { %820 = vsyncpa [#allocation4], 1 }
 0x38e   :  { %822 = vsyncpa [#allocation4 + $0x1], 1 }

</bundles_post_ra>
